<compile_context>
chip_gen: v5e
topology: v5e:2x2
jax: 0.10.0
libtpu: 0.0.40
codegen_flags: <defaults>
</compile_context>

<pallas_src>
import functools
import math

import jax
import jax.numpy as jnp
from jax.experimental import pallas as pl
from jax.experimental.pallas import tpu as pltpu

_LANE = 128


def _round_up(x, m):
    return ((x + m - 1) // m) * m


def _vmem_capacity_bytes():
    try:
        info = pltpu.get_tpu_info()
        cap = getattr(info, "vmem_capacity_bytes", None)
        if cap:
            return int(cap)
    except Exception:  # pragma: no cover - conservative fallback off-TPU
        pass
    return 128 * 1024 * 1024


def _pick_tile_c(C, D, weight_itemsize, vmem_cap):
    """Class-tile size chosen by bytes (per generation), with >=2 tiles when possible."""
    # Per-buffer byte target for the streamed weight tile (double-buffered by the
    # pipeline): ~4 MiB on 64-MiB-VMEM parts (v7x), ~8 MiB on 128-MiB parts.
    target_bytes = (4 << 20) if vmem_cap <= (64 << 20) else (8 << 20)
    c_pad0 = _round_up(C, _LANE)
    # Largest lane-aligned tile hitting the byte target.
    by_bytes = max(_LANE, (target_bytes // max(D * weight_itemsize, 1)) // _LANE * _LANE)
    # Keep ~8+ grid steps (floor of one lane tile) so the parallel class axis has
    # work for both TensorCores and the pipeline actually double-buffers.
    by_parallel = max(_LANE, _round_up(pl.cdiv(c_pad0, 8), _LANE))
    return min(by_bytes, by_parallel, c_pad0)


def _mcp_kernel(x_ref, wt_ref, label_ref, out_ref, *,
                s, cos_m, sin_m, th, mm, eps, tile_c):
    x = x_ref[...].astype(jnp.float32)        # (B, D)
    wt = wt_ref[...].astype(jnp.float32)      # (D, TILE_C)  -- transposed weight tile
    labels = label_ref[...]                   # (B, 1) int32

    # Pre-normalize (rsqrt uses the otherwise-idle EUP slot) so the matmul
    # output IS cosine.  Clamp squared norms at eps -> norm >= sqrt(eps).
    x_inv = jax.lax.rsqrt(jnp.maximum(jnp.sum(x * x, axis=1, keepdims=True), eps))
    w_inv = jax.lax.rsqrt(jnp.maximum(jnp.sum(wt * wt, axis=0, keepdims=True), eps))
    xn = x * x_inv                            # (B, D)
    wn = wt * w_inv                           # (D, TILE_C)

    # cosine = xn @ wn : plain (M,K)x(K,N) contraction on the MXU.
    cosine = jax.lax.dot_general(
        xn, wn, (((1,), (0,)), ((), ())), preferred_element_type=jnp.float32
    )                                         # (B, TILE_C)

    sine = jnp.sqrt(jnp.maximum(1.0 - cosine * cosine, 0.0))
    phi = cosine * cos_m - sine * sin_m
    phi = jnp.where(cosine > th, phi, cosine - mm)

    # one_hot.scatter_(1, label, 1.0) == (global column index == label).
    col0 = pl.program_id(0) * tile_c
    cols = col0 + jax.lax.broadcasted_iota(jnp.int32, cosine.shape, 1)
    one_hot = cols == labels                  # (B, TILE_C) bool

    out_ref[...] = s * jnp.where(one_hot, phi, cosine)


def margin_cosine_product(x, weight, label, *, s=30.0, m=0.4, eps=1e-8,
                          tile_c=None, weight_stream_dtype=None):
    """x: (B, in_features) f32; weight: (out_features, in_features) f32;
    label: (B,) int.  Returns (B, out_features) f32.

    weight_stream_dtype: optionally stream the weight in a narrower dtype
    (e.g. jnp.bfloat16) to halve HBM traffic; the kernel upcasts to f32.
    """
    B, D = x.shape
    C, D2 = weight.shape
    assert D == D2

    w_dtype = jnp.dtype(weight_stream_dtype) if weight_stream_dtype is not None \
        else jnp.dtype(weight.dtype)
    vmem_cap = _vmem_capacity_bytes()

    if tile_c is None:
        tile_c = _pick_tile_c(C, D, w_dtype.itemsize, vmem_cap)
    assert tile_c % _LANE == 0, f"tile_c={tile_c} must be a multiple of {_LANE}"

    c_pad = _round_up(C, tile_c)
    n_tiles = c_pad // tile_c

    # Transpose once in the wrapper (single XLA op on HBM); pad the class axis
    # with zero columns so every tile is full-size.
    wt = weight.T
    if c_pad != C:
        wt = jnp.pad(wt, ((0, 0), (0, c_pad - C)))
    if weight_stream_dtype is not None:
        wt = wt.astype(w_dtype)

    label2d = label.reshape(B, 1).astype(jnp.int32)

    kernel = functools.partial(
        _mcp_kernel,
        s=float(s),
        cos_m=math.cos(m),
        sin_m=math.sin(m),
        th=math.cos(math.pi - m),
        mm=math.sin(math.pi - m) * m,
        eps=float(eps),
        tile_c=tile_c,
    )

    # VMEM budget from the actual (double-buffered) blocks + headroom, capped at
    # half the physical VMEM of this generation.
    block_bytes = (2 * D * tile_c * w_dtype.itemsize        # weight tiles
                   + 2 * B * tile_c * 4                      # output tiles
                   + 2 * B * D * jnp.dtype(x.dtype).itemsize  # resident x
                   + 2 * B * 4)                               # labels
    vmem_limit = int(min(max(block_bytes + (4 << 20), 16 << 20), vmem_cap // 2))

    out = pl.pallas_call(
        kernel,
        out_shape=jax.ShapeDtypeStruct((B, c_pad), jnp.float32),
        grid=(n_tiles,),
        in_specs=[
            pl.BlockSpec((B, D), lambda j: (0, 0)),          # x: resident
            pl.BlockSpec((D, tile_c), lambda j: (0, j)),     # weight^T: streamed tiles
            pl.BlockSpec((B, 1), lambda j: (0, 0)),          # label: resident
        ],
        out_specs=pl.BlockSpec((B, tile_c), lambda j: (0, j)),
        compiler_params=pltpu.CompilerParams(
            dimension_semantics=("parallel",),
            vmem_limit_bytes=vmem_limit,
        ),
    )(x, wt, label2d)

    return out[:, :C] if c_pad != C else out


def _reference(x, weight, label, *, s=30.0, m=0.4, eps=1e-8):
    ip = x @ weight.T
    w1 = jnp.linalg.norm(x, axis=1)
    w2 = jnp.linalg.norm(weight, axis=1)
    cosine = ip / jnp.maximum(jnp.outer(w1, w2), eps)
    sine = jnp.sqrt(jnp.clip(1.0 - cosine**2, 0.0, 1.0))
    phi = cosine * math.cos(m) - sine * math.sin(m)
    phi = jnp.where(cosine > math.cos(math.pi - m), phi,
                    cosine - math.sin(math.pi - m) * m)
    one_hot = jax.nn.one_hot(label, weight.shape[0], dtype=cosine.dtype)
    return s * (one_hot * phi + (1.0 - one_hot) * cosine)


if __name__ == "__main__":
    in_features = 32
    out_features = 500     # NOT a multiple of 128 -> exercises padding + slicing
    batch = 8

    key = jax.random.PRNGKey(0)
    kx, kw, kl = jax.random.split(key, 3)

    # Deterministic xavier_uniform init for weight (out_features, in_features).
    bound = math.sqrt(6.0 / (in_features + out_features))
    weight = jax.random.uniform(
        kw, (out_features, in_features), jnp.float32, minval=-bound, maxval=bound
    )
    x = jax.random.normal(kx, (batch, in_features), jnp.float32)
    label = jax.random.randint(kl, (batch,), 0, out_features, jnp.int32)

    out = margin_cosine_product(x, weight, label)
    out = jax.block_until_ready(out)

    ref = _reference(x, weight, label)
    assert out.shape == (batch, out_features)
    assert jnp.allclose(out, ref, atol=1e-4, rtol=1e-4), "mismatch vs reference"

    print("KERNEL_OK")
</pallas_src>

<mosaic_0001>
module attributes {stable_mosaic.version = 11 : i64} {
  func.func @_mcp_kernel(%arg0: i32, %arg1: memref<8x32xf32, #tpu.memory_space<vmem>>, %arg2: memref<32x128xf32, #tpu.memory_space<vmem>>, %arg3: memref<8x1xi32, #tpu.memory_space<vmem>>, %arg4: memref<8x128xf32, #tpu.memory_space<vmem>>) attributes {dimension_semantics = [#tpu.dimension_semantics<parallel>], iteration_bounds = array<i64: 4>, scalar_prefetch = 0 : i64, scratch_operands = 0 : i64, tpu.core_type = #tpu.core_type<tc>, window_params = [{pipeline_mode = #tpu.pipeline_mode<synchronous>, transform_indices = @transform_0, window_bounds = array<i64: 8, 32>}, {transform_indices = @transform_1, window_bounds = array<i64: 32, 128>}, {pipeline_mode = #tpu.pipeline_mode<synchronous>, transform_indices = @transform_2, window_bounds = array<i64: 8, 1>}, {transform_indices = @transform_3, window_bounds = array<i64: 8, 128>}]} {
    %c0 = arith.constant 0 : index
    %c0_0 = arith.constant 0 : index
    %0 = vector.load %arg1[%c0, %c0_0] : memref<8x32xf32, #tpu.memory_space<vmem>>, vector<8x32xf32>
    %c0_1 = arith.constant 0 : index
    %c0_2 = arith.constant 0 : index
    %1 = vector.load %arg2[%c0_1, %c0_2] : memref<32x128xf32, #tpu.memory_space<vmem>>, vector<32x128xf32>
    %c0_3 = arith.constant 0 : index
    %c0_4 = arith.constant 0 : index
    %2 = vector.load %arg3[%c0_3, %c0_4] : memref<8x1xi32, #tpu.memory_space<vmem>>, vector<8x1xi32>
    %3 = arith.mulf %0, %0 : vector<8x32xf32>
    %cst = arith.constant dense<0.000000e+00> : vector<8xf32>
    %4 = vector.multi_reduction <add>, %3, %cst [1] : vector<8x32xf32> to vector<8xf32>
    %5 = vector.shape_cast %4 : vector<8xf32> to vector<8x1xf32>
    %cst_5 = arith.constant 9.99999993E-9 : f32
    %6 = vector.broadcast %cst_5 : f32 to vector<8x1xf32>
    %7 = arith.maximumf %5, %6 : vector<8x1xf32>
    %8 = math.rsqrt %7 : vector<8x1xf32>
    %9 = arith.mulf %1, %1 : vector<32x128xf32>
    %cst_6 = arith.constant dense<0.000000e+00> : vector<128xf32>
    %10 = vector.multi_reduction <add>, %9, %cst_6 [0] : vector<32x128xf32> to vector<128xf32>
    %11 = vector.shape_cast %10 : vector<128xf32> to vector<1x128xf32>
    %cst_7 = arith.constant 9.99999993E-9 : f32
    %12 = vector.broadcast %cst_7 : f32 to vector<1x128xf32>
    %13 = arith.maximumf %11, %12 : vector<1x128xf32>
    %14 = math.rsqrt %13 : vector<1x128xf32>
    %15 = vector.broadcast %8 : vector<8x1xf32> to vector<8x32xf32>
    %16 = arith.mulf %0, %15 : vector<8x32xf32>
    %17 = vector.broadcast %14 : vector<1x128xf32> to vector<32x128xf32>
    %18 = arith.mulf %1, %17 : vector<32x128xf32>
    %cst_8 = arith.constant dense<0.000000e+00> : vector<8x128xf32>
    %19 = tpu.matmul %16, %18, %cst_8 {dimension_numbers = #tpu.dot_dimension_numbers<[1], [0], [0], [1], [0, 0, 1, 1], [], []>} : vector<8x32xf32>, vector<32x128xf32>, vector<8x128xf32> -> vector<8x128xf32>
    %20 = arith.mulf %19, %19 : vector<8x128xf32>
    %cst_9 = arith.constant 1.000000e+00 : f32
    %21 = vector.broadcast %cst_9 : f32 to vector<8x128xf32>
    %22 = arith.subf %21, %20 : vector<8x128xf32>
    %cst_10 = arith.constant 0.000000e+00 : f32
    %23 = vector.broadcast %cst_10 : f32 to vector<8x128xf32>
    %24 = arith.maximumf %22, %23 : vector<8x128xf32>
    %25 = math.sqrt %24 : vector<8x128xf32>
    %cst_11 = arith.constant 0.921060979 : f32
    %26 = vector.broadcast %cst_11 : f32 to vector<8x128xf32>
    %27 = arith.mulf %19, %26 : vector<8x128xf32>
    %cst_12 = arith.constant 0.389418334 : f32
    %28 = vector.broadcast %cst_12 : f32 to vector<8x128xf32>
    %29 = arith.mulf %25, %28 : vector<8x128xf32>
    %30 = arith.subf %27, %29 : vector<8x128xf32>
    %cst_13 = arith.constant -0.921060979 : f32
    %31 = vector.broadcast %cst_13 : f32 to vector<8x128xf32>
    %32 = arith.cmpf ogt, %19, %31 : vector<8x128xf32>
    %cst_14 = arith.constant 0.155767336 : f32
    %33 = vector.broadcast %cst_14 : f32 to vector<8x128xf32>
    %34 = arith.subf %19, %33 : vector<8x128xf32>
    %35 = arith.select %32, %30, %34 : vector<8x128xi1>, vector<8x128xf32>
    %c128_i32 = arith.constant 128 : i32
    %36 = arith.muli %arg0, %c128_i32 : i32
    %37 = tpu.iota {dimensions = array<i32: 1>} : vector<8x128xi32>
    %38 = vector.broadcast %36 : i32 to vector<8x128xi32>
    %39 = arith.addi %38, %37 : vector<8x128xi32>
    %40 = vector.broadcast %2 : vector<8x1xi32> to vector<8x128xi32>
    %41 = arith.cmpi eq, %39, %40 : vector<8x128xi32>
    %42 = arith.select %41, %35, %19 : vector<8x128xi1>, vector<8x128xf32>
    %cst_15 = arith.constant 3.000000e+01 : f32
    %43 = vector.broadcast %cst_15 : f32 to vector<8x128xf32>
    %44 = arith.mulf %43, %42 : vector<8x128xf32>
    %c0_16 = arith.constant 0 : index
    %c0_17 = arith.constant 0 : index
    %45 = vector.load %arg4[%c0_16, %c0_17] : memref<8x128xf32, #tpu.memory_space<vmem>>, vector<8x128xf32>
    tpu.vector_store %arg4[%c0_16, %c0_17], %44 {strides = array<i32>} : memref<8x128xf32, #tpu.memory_space<vmem>>, vector<8x128xf32>,
    return
  }
  func.func @transform_0(%arg0: i32) -> (i32, i32) {
    %c0_i32 = arith.constant 0 : i32
    %c0_i32_0 = arith.constant 0 : i32
    %c0_i32_1 = arith.constant 0 : i32
    return %c0_i32, %c0_i32_0 : i32, i32
  }
  func.func @transform_1(%arg0: i32) -> (i32, i32) {
    %c0_i32 = arith.constant 0 : i32
    %c0_i32_0 = arith.constant 0 : i32
    return %c0_i32, %arg0 : i32, i32
  }
  func.func @transform_2(%arg0: i32) -> (i32, i32) {
    %c0_i32 = arith.constant 0 : i32
    %c0_i32_0 = arith.constant 0 : i32
    %c0_i32_1 = arith.constant 0 : i32
    return %c0_i32, %c0_i32_0 : i32, i32
  }
  func.func @transform_3(%arg0: i32) -> (i32, i32) {
    %c0_i32 = arith.constant 0 : i32
    %c0_i32_0 = arith.constant 0 : i32
    return %c0_i32, %arg0 : i32, i32
  }
}

</mosaic_0001>

<bundles_post_ra>
// kernel: tpu_custom_call.1
= control target key start
LH: loop header
LB: loop body
LE: loop exit
PB: predicated region body
PF: predicated region fallthrough
CT: control target
= control target key end

     0   :  { %8 = vsyncpa [#allocation3], 0  ;;  %s710_s0 = inlined_call_operand.vmem [shape: f32[8,32], index: 0, kind: input, shape index: {}]   ;;  %s711_s1 = inlined_call_operand.hbm [shape: f32[32,512], index: 1, kind: input, shape index: {}]   ;;  %s712_s2 = inlined_call_operand.vmem [shape: s32[8,1], index: 2, kind: input, shape index: {}]   ;;  %s713_s3 = inlined_call_operand.hbm [shape: f32[8,512], index: 3, kind: output, shape index: {}]  }
   0x1   :  { %10 = vsyncpa [#allocation3 + $0x1], 0 }
   0x2   :  { %11 = vsyncpa [#allocation4], 0 }
   0x3   :  { %13 = vsyncpa [#allocation4 + $0x1], 0  ;;  %s577_s12 = smov 0   ;;  %s579_s13 = smov 0  }
   0x4   :  { %s581_s14 = smov 0   ;;  %s583_s15 = smov 0  }
   0x5 LB: > { %s598_s16 = sadd.s32 4294967295, %s551_s15   ;;  %s383_s17 = sadd.s32 4294967294, %s551_s15   ;;  %s551_s15 = sphi %s583_s15, %s722_s15   ;;  %s547_s14 = sphi %s581_s14, %s721_s14   ;;  %s543_s13 = sphi %s579_s13, %s720_s13   ;;  %s539_s12 = sphi %s577_s12, %s719_s12  }
   0x6   : > { %s602_s18 = sadd.s32 1, %s551_s15   ;;  %s47_s19 = sadd.s32 1, %s547_s14 }
   0x7   : > { %s44_s20 = ssub.s32 %s551_s15, %s602_s18  ;;  %p54_p0 = scmp.ne.s32.totalorder %s547_s14, %s543_s13 }
   0x8   : > { %p45_p1 = scmp.eq.s32.totalorder %s44_s20, 0  ;;  %p55_p2 = scmp.eq.s32.totalorder %s551_s15, 0 }
   0x9   : > { %p60_p3 = scmp.ne.s32.totalorder %s543_s13, %s539_s12  ;;  %p61_p4 = scmp.eq.s32.totalorder %s598_s16, 0 }
   0xa   : > { %s614_s21 = scalar_select %p45_p1, %s547_s14, %s47_s19  }
   0xb   : > { %p616_p5 = por %p55_p2, %p54_p0  ;;  %p620_p6 = por %p61_p4, %p60_p3 }
   0xc   : > { %p105_p7 = scmp.eq.s32.totalorder %s598_s16, 3  ;;  %p111_p8 = scmp.eq.s32.totalorder %s383_s17, 3 }
   0xd   : > { %p410_p9 = scmp.lt.s32.totalorder %s551_s15, 4  ;;  %s137_s26 = sand.u32 1, %s547_s14  }
   0xe   : > { %p626_p10 = por %p105_p7, %p54_p0  ;;  %p630_p11 = por %p111_p8, %p60_p3 }
   0xf   : > { %s387_s27 = sshll.u32 %s551_s15, 3  ;;  %s386_s28 = sshll.u32 %s137_s26, 5 }
  0x10   : > { %s145_s4 = scalar_lea.hbm %s711_s1, %s387_s27  ;;  %s141_s6 = scalar_lea.vmem [#allocation2], %s386_s28 }
  0x11   : > { %s146_s5 = sshll.u32 %s145_s4, 4  ;;  %s148_s7 = sshll.u32 %s141_s6, 4  ;;  %s147_s5 = int_to_ptr.hbm [resolvable:$true] %s146_s5  ;;  %s149_s7 = int_to_ptr.vmem [resolvable:$true] %s148_s7 }
  0x12   : > { %p641_p12 = pnand %p410_p9, %p616_p5  ;;  %p388_p13 = scmp.ge.s32.totalorder %s551_s15, 1 }
  0x13   : > { %s138_s9 = scalar_lea.sflag [#allocation3], %s137_s26  ;;  %s455_s10 = sshra.s32 %s147_s5, 4  ;;  %s456_s10 = int_to_ptr.hbm [resolvable:$true] %s455_s10 }
  0x14   : > { %s457_s11 = scalar_lea.hbm %s456_s10, 32  ;;  %p459_p1 = pneg %p641_p12 }
  0x15   : > { %p458_p0 = scmp.ne.s32.totalorder %s456_s10, %s457_s11  ;;  %s462_s20 = scalar_lea.hbm %s711_s1, 128 }
  0x16   : > { %p463_p4 = scmp.lt.s32.totalorder %s456_s10, %s711_s1  ;;  %p464_p5 = scmp.lt.s32.totalorder %s462_s20, %s457_s11 }
  0x17   : > { %p460_p2 = pnand %p459_p1, %p458_p0 }
  0x18   : > { %p465_p7 = por %p464_p5, %p463_p4 }
  0x19   : > { %p461_p3 = pneg %p460_p2 }
  0x1b   : > { %p466_p8 = pnand %p465_p7, %p461_p3 }
  0x1d   : > { %469 = shalt.err (!%p466_p8)
}
  0x1e   : > { %s553_s26 = smov 512   ;;  %s554_s28 = smov 128  }
  0x1f   : > { %s555_s29 = smov 8   ;;  %p156_p9 = scmp.lt.s32.totalorder %s551_s15, 5 }
  0x20   : > { %405 = dma.hbm_to_vmem [thread:$0]  (!%p641_p12), %s147_s5, 512, %s149_s7, %s138_s9, %s553_s26, %s554_s28, %s555_s29  }
  0x21   : > { %p157_p0 = pnand %p388_p13, %p156_p9 }
  0x22   : > { %s660_s30 = sand.u32 (!%p157_p0), 1, %s543_s13  }
  0x23   : > { %160 = sbr.rel (%p157_p0) target bundleno = 347 (0x15b), region = 32  ;;  %s389_s4 = sshll.u32 (!%p157_p0), %s660_s30, 5 }
  0x24   : > { %s163_s6 = scalar_lea.sflag (!%p157_p0), [#allocation3], %s660_s30  ;;  %s166_s10 = scalar_lea.vmem (!%p157_p0), [#allocation2], %s389_s4 }
  0x28   : > { %530 = dma.done.wait (%p620_p6), %s163_s6, 512  }
  0x29   : > { %532 = vsyncadd (%p620_p6), %s163_s6, 4294966784  ;;  %v190_v0 = vld [vmem:[%s710_s0] sm:$0xff]  ;;  %vm197_vm0 = vcmask 261120   ;;  %v192_v4 = vld [vmem:[%s166_s10 + $0x8] sm:$0xff]  ;;  %v556_v33 = vmov 0   ;;  %v286_v52 = vlaneseq  ;;  %s393_s9 = sshll.u32 %s598_s16, 7 }
  0x2a   : > { %v196_v1 = vmul.f32 %v190_v0, %v190_v0  ;;  %v191_v3 = vld [vmem:[%s166_s10] sm:$0xff]  ;;  %v213_v6 = vmul.f32 %v192_v4, %v192_v4  ;;  %v193_v7 = vld [vmem:[%s166_s10 + $0x10] sm:$0xff]  ;;  %v194_v10 = vld [vmem:[%s166_s10 + $0x18] sm:$0xff]  ;;  %448 = vset.pattern.permute.xlu0 %v556_v33  ;;  %v288_v56 = vstv %s393_s9  ;;  %s390_s11 = sshll.u32 %s660_s30, 3  ;;  %s395_s17 = sshll.u32 %s598_s16, 3 }
  0x2b   : > { %v212_v5 = vmul.f32 %v191_v3, %v191_v3  ;;  %v214_v8 = vmul.f32 %v193_v7, %v193_v7  ;;  %v215_v11 = vmul.f32 %v194_v10, %v194_v10  ;;  %v195_v32 = vld [vmem:[%s712_s2] sm:$0xff]  ;;  %v287_v55 = vand.u32 127, %v286_v52  ;;  %s308_s22 = scalar_lea.hbm %s713_s3, %s395_s17  ;;  %s189_s27 = scalar_lea.vmem [#allocation5], %s390_s11 }
  0x2c   : > { %v198_v2 = vsel %vm197_vm0, %v196_v1, 0.0  ;;  %s310_s26 = sshll.u32 %s189_s27, 4  ;;  %s312_s16 = sshll.u32 %s308_s22, 4  ;;  %s311_s26 = int_to_ptr.vmem [resolvable:$true] %s310_s26  ;;  %s313_s16 = int_to_ptr.hbm [resolvable:$true] %s312_s16 }
  0x2d   : > { %199 = vadd.xlane.f32.xlu0 %v198_v2  ;;  %v216_v9 = vadd.f32 %v213_v6, %v212_v5  ;;  %v289_v60 = vadd.s32 %v288_v56, %v287_v55  ;;  %s298_s28 = scalar_lea.sflag [#allocation4], %s660_s30  ;;  %s499_s29 = sshra.s32 %s313_s16, 4  ;;  %s500_s29 = int_to_ptr.hbm [resolvable:$true] %s499_s29 }
  0x2e   : > { %s501_s4 = scalar_lea.hbm %s500_s29, 8  ;;  %s505_s8 = scalar_lea.hbm %s713_s3, 32 }
  0x2f   : > { %v217_v12 = vadd.f32 %v216_v9, %v214_v8  ;;  %p502_p6 = scmp.ne.s32.totalorder %s500_s29, %s501_s4  ;;  %p506_p1 = scmp.lt.s32.totalorder %s500_s29, %s713_s3 }
  0x30   : > { %p507_p2 = scmp.lt.s32.totalorder %s505_s8, %s501_s4 }
  0x31   : > { %v218_v13 = vadd.f32 %v217_v12, %v215_v11  ;;  %p503_p12 = pnand %p502_p6, %p626_p10 }
  0x32   : > { %p508_p3 = por %p507_p2, %p506_p1 }
  0x33   : > { %v219_v14 = vrot.slane %v218_v13, 4  ;;  %p504_p13 = pneg %p503_p12 }
  0x35   : > { %v220_v15 = vadd.f32 %v219_v14, %v218_v13  ;;  %p509_p4 = pnand %p508_p3, %p504_p13 }
  0x37   : > { %v221_v16 = vrot.slane %v220_v15, 2 }
  0x39   : > { %v222_v17 = vadd.f32 %v221_v16, %v220_v15 }
  0x3b   : > { %v223_v18 = vrot.slane %v222_v17, 1 }
  0x3d   : > { %v224_v19 = vadd.f32 %v223_v18, %v222_v17 }
  0x3f   : > { %v225_v20 = vmax.f32 %v224_v19, 1e-08 }
  0x41   : > { %449 = vrsqrt.f32 %v225_v20  ;;  %vm232_vm1 = vweird.f32 %v225_v20  ;;  %291 = vperm.xlu0 %448, %v195_v32  }
  0x47   : > { %v450_v21 = vpop.eup %449 }
  0x48   : > { %v227_v22 = vmul.f32 %v450_v21, %v225_v20  ;;  %vm233_vm2 = vweird.f32 %v450_v21 }
  0x49   : > { %vm234_vm3 = vmor %vm232_vm1, %vm233_vm2 }
  0x4a   : > { %v228_v23 = vmul.f32 %v450_v21, %v227_v22 }
  0x4c   : > { %v229_v24 = vmul.f32 0.5, %v228_v23 }
  0x4e   : > { %v230_v25 = vsub.f32 1.5, %v229_v24 }
  0x50   : > { %v231_v26 = vmul.f32 %v450_v21, %v230_v25 }
  0x52   : > { %v235_v27 = vsel %vm234_vm3, %v450_v21, %v231_v26 }
  0x53   : > { %v240_v28 = vmul.f32 %v235_v27, %v194_v10  ;;  %v239_v29 = vmul.f32 %v235_v27, %v193_v7  ;;  %v238_v30 = vmul.f32 %v235_v27, %v192_v4  ;;  %v237_v31 = vmul.f32 %v235_v27, %v191_v3 }
  0x55   : > { %256 = vmatpush.msra.mxu0 %v240_v28 }
  0x57   : > { %257 = vmatpush.msra.mxu0 %v239_v29 }
  0x59   : > { %258 = vmatpush.msra.mxu0 %v238_v30 }
  0x5b   : > { %259 = vmatpush.msra.mxu0 %v237_v31 }
  0xa0   : > { %v200_v34 = vpop.xlane.xlu0 %199 }
  0xa1   : > { %v201_v35 = vmax.f32 %v200_v34, 1e-08 }
  0xa3   : > { %451 = vrsqrt.f32 %v201_v35  ;;  %vm208_vm5 = vweird.f32 %v201_v35 }
  0xa9   : > { %v452_v36 = vpop.eup %451 }
  0xaa   : > { %v203_v37 = vmul.f32 %v452_v36, %v201_v35  ;;  %vm209_vm4 = vweird.f32 %v452_v36 }
  0xab   : > { %vm210_vm6 = vmor %vm208_vm5, %vm209_vm4 }
  0xac   : > { %v204_v38 = vmul.f32 %v452_v36, %v203_v37 }
  0xae   : > { %v205_v39 = vmul.f32 0.5, %v204_v38 }
  0xb0   : > { %v206_v40 = vsub.f32 1.5, %v205_v39 }
  0xb2   : > { %v207_v41 = vmul.f32 %v452_v36, %v206_v40 }
  0xb3   : > { %v292_v62 = vpop.permute.xlu0 %291 }
  0xb4   : > { %v211_v42 = vsel %vm210_vm6, %v452_v36, %v207_v41  ;;  %vm293_vm9 = vcmp.eq.s32.totalorder %v289_v60, %v292_v62 }
  0xb5   : > { %v236_v43 = vmul.f32 %v211_v42, %v190_v0 }
  0xb7   : > { %391 = vmatmul.msk.f32.vlgmr.msra.gmra.mxu0 %vm197_vm0, %v236_v43 }
 0x134   : > { %v261_v44 = vpop.f32.mrf.mxu0 }
 0x135   : > { %v264_v45 = vmul.f32 %v261_v44, %v261_v44  ;;  %v279_v63 = vmul.f32 0.921061, %v261_v44  ;;  %v392_v2 = vadd.f32 -0.15576734, %v261_v44  ;;  %vm282_vm10 = vcmp.gt.f32.partialorder %v261_v44, -0.921061 }
 0x137   : > { %v265_v46 = vsub.f32 1.0, %v264_v45 }
 0x139   : > { %v266_v47 = vmax.f32 %v265_v46, 0.0 }
 0x13b   : > { %453 = vrsqrt.f32 %v266_v47  ;;  %vm274_vm7 = vcmp.eq.f32.partialorder %v266_v47, inf  ;;  %v277_v58 = vand.u32 2147483648, %v266_v47  ;;  %vm276_vm8 = vcmp.eq.f32.partialorder %v266_v47, 0.0 }
 0x141   : > { %v454_v48 = vpop.eup %453 }
 0x142   : > { %v268_v49 = vmul.f32 %v454_v48, %v266_v47 }
 0x144   : > { %v269_v50 = vmul.f32 %v454_v48, %v268_v49 }
 0x146   : > { %v270_v51 = vmul.f32 0.5, %v269_v50 }
 0x148   : > { %v271_v53 = vsub.f32 1.5, %v270_v51 }
 0x14a   : > { %v272_v54 = vmul.f32 %v454_v48, %v271_v53 }
 0x14c   : > { %v273_v57 = vmul.f32 %v272_v54, %v266_v47 }
 0x14e   : > { %v275_v59 = vsel %vm274_vm7, %v266_v47, %v273_v57 }
 0x14f   : > { %v278_v61 = vsel %vm276_vm8, %v277_v58, %v275_v59 }
 0x150   : > { %v280_v0 = vmul.f32 0.38941833, %v278_v61 }
 0x152   : > { %v281_v1 = vsub.f32 %v279_v63, %v280_v0 }
 0x154   : > { %v284_v3 = vsel %vm282_vm10, %v281_v1, %v392_v2 }
 0x155   : > { %v294_v4 = vsel %vm293_vm9, %v284_v3, %v261_v44 }
 0x156   : > { %v295_v5 = vmul.f32 30.0, %v294_v4 }
 0x158   : > { %296 = vst [vmem:[%s189_s27] sm:$0xff] %v295_v5 }
 0x159   : > { %512 = shalt.err (!%p509_p4)
}
 0x15a   : > { %400 = dma.vmem_to_hbm [thread:$0]  (%p626_p10), %s311_s26, 128, %s313_s16, %s298_s28  }
 0x15b PF: > { %p411_p5 = scmp.ge.s32.totalorder %s551_s15, 2  ;;  %s324_s30 = sand.u32 1, %s539_s12  }
 0x15c   : > { %s325_s7 = scalar_lea.sflag [#allocation4], %s324_s30 }
 0x15d   : > { %p407_p7 = pnand %p411_p5, %p630_p11 }
 0x15f   : > { %p408_p8 = pneg %p407_p7 }
 0x161   : > { %534 = dma.done.wait (%p408_p8), %s325_s7, 128  }
 0x162   : > { %536 = vsyncadd (%p408_p8), %s325_s7, 4294967168  ;;  %p16_p9 = scmp.ge.s32.totalorder %s602_s18, 6   ;;  %s719_s12 = smov %s543_s13 }
 0x163   : > { %s720_s13 = smov %s547_s14  ;;  %s721_s14 = smov %s614_s21 }
 0x164   : > { %s722_s15 = smov %s602_s18  ;;  %18 = sbr.rel (!%p16_p9) target bundleno = 5 (0x5), region = 77 }
 0x169   :  { %331 = vsyncpa [#allocation3], 1 }
 0x16a   :  { %333 = vsyncpa [#allocation3 + $0x1], 1 }
 0x16b   :  { %334 = vsyncpa [#allocation4], 1 }
 0x16c   :  { %336 = vsyncpa [#allocation4 + $0x1], 1 }

</bundles_post_ra>
